<compile_context>
chip_gen: v7x
topology: tpu7x:2x2x1
jax: 0.10.0
libtpu: 0.0.40
codegen_flags: <defaults>
</compile_context>

<pallas_src>
import functools
import math

import jax
import jax.numpy as jnp
from jax.experimental import pallas as pl
from jax.experimental.pallas import tpu as pltpu


# Left halo of the in-kernel padding scratch.  16 sublanes == one bf16 (16,128)
# tile, so the interior store `pad_ref[1:H+1, _LPAD:_LPAD+W, :] = x` is
# tile-aligned; the 3x3 taps read at offsets _LPAD-1 .. _LPAD+1 (unaligned
# *loads*, which the load path handles cheaply).
_LPAD = 16


# --------------------------------------------------------------------------
# Pallas kernels
# --------------------------------------------------------------------------
def _matmul_bias_act_kernel(x_ref, w_ref, b_ref, o_ref, *, relu):
    # bf16 x bf16 -> f32 accumulate on the MXU.  BN scale is pre-folded into the
    # weight columns, so the epilogue is just  + bias (+ ReLU)  in f32.
    y = jnp.dot(x_ref[...], w_ref[...], preferred_element_type=jnp.float32)
    y = y + b_ref[...]
    if relu:
        y = jnp.maximum(y, 0.0)
    o_ref[...] = y.astype(o_ref.dtype)


def _matmul_bias_res_act_kernel(x_ref, w_ref, b_ref, r_ref, o_ref, *, relu):
    # Same as above but fuses the residual add (ShuffleNet "add" fusion) + ReLU.
    y = jnp.dot(x_ref[...], w_ref[...], preferred_element_type=jnp.float32)
    y = y + b_ref[...] + r_ref[...].astype(jnp.float32)
    if relu:
        y = jnp.maximum(y, 0.0)
    o_ref[...] = y.astype(o_ref.dtype)


def _dwconv3x3_s1_kernel(x_ref, w_ref, b_ref, o_ref, pad_ref, *, H, W, relu):
    # 3x3 stride-1 depthwise conv, padding=1.  The 1-pixel halo is built inside
    # the kernel in a zeroed VMEM scratch (no host-side jnp.pad / extra HBM pass).
    #   x_ref:   (1, H, W, C) bf16 unpadded input tile
    #   pad_ref: (H+2, W+2*_LPAD, C) bf16 scratch; x lives at [1:H+1, _LPAD:_LPAD+W)
    #   w_ref:   (9, C) f32 taps with BN scale pre-folded
    pad_ref[...] = jnp.zeros_like(pad_ref)
    pad_ref[1:H + 1, _LPAD:_LPAD + W, :] = x_ref[0]
    s = pad_ref[...]                      # bf16; per-tap slices are cast to f32
    w = w_ref[...]
    acc = None
    for t in range(9):
        ki, kj = t // 3, t % 3
        c0 = _LPAD - 1 + kj
        term = s[ki:ki + H, c0:c0 + W, :].astype(jnp.float32) * w[t:t + 1, :]
        acc = term if acc is None else acc + term
    y = acc + b_ref[...]
    if relu:
        y = jnp.maximum(y, 0.0)
    o_ref[0] = y.astype(o_ref.dtype)


def _dwconv3x3_s2_kernel(x_ref, w_ref, b_ref, o_ref, *, Ho, Wo, relu):
    # Stride-2 3x3 depthwise conv on parity planes: x_ref is (1, 4, Ho+1, Wo+1, C)
    # where plane p = (row_parity * 2 + col_parity) of the padded input.  Only the
    # Ho x Wo needed outputs are computed (no 4x over-compute).  Planes stay bf16;
    # each tap slice is cast to f32 individually.
    w = w_ref[...]
    planes = [x_ref[0, q] for q in range(4)]           # bf16
    acc = None
    for t in range(9):
        ki, kj = t // 3, t % 3
        p = (ki % 2) * 2 + (kj % 2)
        oi, oj = ki // 2, kj // 2
        xt = planes[p][oi:oi + Ho, oj:oj + Wo, :].astype(jnp.float32)
        term = xt * w[t:t + 1, :]
        acc = term if acc is None else acc + term
    y = acc + b_ref[...]
    if relu:
        y = jnp.maximum(y, 0.0)
    o_ref[0] = y.astype(o_ref.dtype)


# --------------------------------------------------------------------------
# Cached pallas_call builders (one compile per unique shape/flag combo)
# --------------------------------------------------------------------------
@functools.lru_cache(maxsize=None)
def _get_matmul(M, K, N, relu, has_res, TM, out_dtype_name):
    out_dtype = jnp.dtype(out_dtype_name)
    in_specs = [
        pl.BlockSpec((TM, K), lambda i: (i, 0)),
        pl.BlockSpec((K, N), lambda i: (0, 0)),
        pl.BlockSpec((1, N), lambda i: (0, 0)),
    ]
    if has_res:
        in_specs.append(pl.BlockSpec((TM, N), lambda i: (i, 0)))
        kernel = functools.partial(_matmul_bias_res_act_kernel, relu=relu)
    else:
        kernel = functools.partial(_matmul_bias_act_kernel, relu=relu)
    call = pl.pallas_call(
        kernel,
        out_shape=jax.ShapeDtypeStruct((M, N), out_dtype),
        grid=(M // TM,),
        in_specs=in_specs,
        out_specs=pl.BlockSpec((TM, N), lambda i: (i, 0)),
        compiler_params=pltpu.CompilerParams(dimension_semantics=("parallel",)),
    )
    return jax.jit(call)


@functools.lru_cache(maxsize=None)
def _get_dwconv_s1(N, H, W, C, relu):
    kernel = functools.partial(_dwconv3x3_s1_kernel, H=H, W=W, relu=relu)
    call = pl.pallas_call(
        kernel,
        out_shape=jax.ShapeDtypeStruct((N, H, W, C), jnp.bfloat16),
        grid=(N,),
        in_specs=[
            pl.BlockSpec((1, H, W, C), lambda n: (n, 0, 0, 0)),
            pl.BlockSpec((9, C), lambda n: (0, 0)),
            pl.BlockSpec((1, C), lambda n: (0, 0)),
        ],
        out_specs=pl.BlockSpec((1, H, W, C), lambda n: (n, 0, 0, 0)),
        scratch_shapes=[pltpu.VMEM((H + 2, W + 2 * _LPAD, C), jnp.bfloat16)],
        compiler_params=pltpu.CompilerParams(dimension_semantics=("parallel",)),
    )
    return jax.jit(call)


@functools.lru_cache(maxsize=None)
def _get_dwconv_s2(N, Ho, Wo, C, relu):
    kernel = functools.partial(_dwconv3x3_s2_kernel, Ho=Ho, Wo=Wo, relu=relu)
    call = pl.pallas_call(
        kernel,
        out_shape=jax.ShapeDtypeStruct((N, Ho, Wo, C), jnp.bfloat16),
        grid=(N,),
        in_specs=[
            pl.BlockSpec((1, 4, Ho + 1, Wo + 1, C), lambda n: (n, 0, 0, 0, 0)),
            pl.BlockSpec((9, C), lambda n: (0, 0)),
            pl.BlockSpec((1, C), lambda n: (0, 0)),
        ],
        out_specs=pl.BlockSpec((1, Ho, Wo, C), lambda n: (n, 0, 0, 0)),
        compiler_params=pltpu.CompilerParams(dimension_semantics=("parallel",)),
    )
    return jax.jit(call)


def _pick_tm(M):
    # Largest row tile that (a) divides M and (b) leaves >= 2 grid steps so the
    # parallel axis can be sharded across both v7x TensorCores; 512 cap gives
    # fewer, larger grid steps / DMAs on v5e/v6e for big M.  Tiny late-stage
    # matmuls (M < 16) legitimately stay single-step.
    for t in (512, 256, 128, 64, 32, 16, 8):
        if M % t == 0 and M // t >= 2:
            return t
    return M  # tiny or awkward M: a single full-extent block is always legal


# --------------------------------------------------------------------------
# Layer wrappers
# --------------------------------------------------------------------------
def matmul_bias_act(x, w, bias, relu, residual=None, out_dtype=jnp.bfloat16):
    M, K = x.shape
    N = w.shape[1]
    TM = _pick_tm(M)
    fn = _get_matmul(M, K, N, bool(relu), residual is not None, TM,
                     jnp.dtype(out_dtype).name)
    args = [x.astype(jnp.bfloat16), w.astype(jnp.bfloat16),
            bias.reshape(1, N).astype(jnp.float32)]
    if residual is not None:
        args.append(residual.astype(jnp.bfloat16))
    return fn(*args)


def depthwise_conv3x3_bn(x, w9, bias, relu=False, stride=1):
    # x: (N, H, W, C) bf16;  w9: (9, C) f32 (BN scale pre-folded);  bias: (C,) f32
    N, H, W, C = x.shape
    w9 = w9.astype(jnp.float32)
    b = bias.reshape(1, C).astype(jnp.float32)
    if stride == 1:
        fn = _get_dwconv_s1(N, H, W, C, bool(relu))
        return fn(x.astype(jnp.bfloat16), w9, b)
    # stride-2: split the padded input into 4 parity planes so the kernel only
    # computes the Ho x Wo outputs that are actually needed.
    # TODO(synk): odd H/W would need PyTorch's floor((H-1)/2)+1 handling.
    assert H % 2 == 0 and W % 2 == 0, "stride-2 path assumes even spatial dims"
    xp = jnp.pad(x, ((0, 0), (1, 1), (1, 1), (0, 0)))
    Ho, Wo = H // 2, W // 2
    xr = xp.reshape(N, Ho + 1, 2, Wo + 1, 2, C)
    xr = jnp.transpose(xr, (0, 2, 4, 1, 3, 5)).reshape(N, 4, Ho + 1, Wo + 1, C)
    fn = _get_dwconv_s2(N, Ho, Wo, C, bool(relu))
    return fn(xr.astype(jnp.bfloat16), w9, b)


def avgpool3x3_s2_p1(x, relu=False):
    # AvgPool2d(3, stride=2, padding=1), count_include_pad=True == dw conv w=1/9.
    C = x.shape[-1]
    w = jnp.full((9, C), 1.0 / 9.0, jnp.float32)
    return depthwise_conv3x3_bn(x, w, jnp.zeros((C,), jnp.float32),
                                relu=relu, stride=2)


def pointwise_dense_bn(x, w, bias, relu, residual=None):
    # Grouped 1x1 conv as a single block-diagonal dense matmul (weights prepared
    # block-diag + BN-scaled at init); output is a lane-dense (M, Cout) slab.
    N, H, W, Cin = x.shape
    Cout = w.shape[1]
    xm = x.reshape(N * H * W, Cin)
    rm = residual.reshape(N * H * W, Cout) if residual is not None else None
    y = matmul_bias_act(xm, w, bias, relu, residual=rm)
    return y.reshape(N, H, W, Cout)


def conv3x3_dense_bn_relu(x, w27, bias):
    # stem conv: dense 3x3, stride 1, pad 1 via im2col + Pallas matmul (BN+ReLU fused)
    N, H, W, Cin = x.shape
    Cout = w27.shape[1]
    xp = jnp.pad(x, ((0, 0), (1, 1), (1, 1), (0, 0)))
    cols = [xp[:, i:i + H, j:j + W, :] for i in range(3) for j in range(3)]
    patches = jnp.concatenate(cols, axis=-1)            # (N,H,W,9*Cin) order (kh,kw,ci)
    xm = patches.reshape(N * H * W, 9 * Cin)
    y = matmul_bias_act(xm, w27, bias, relu=True)
    return y.reshape(N, H, W, Cout)


def shuffle_unit_forward(x, p):
    final_relu = not p["before_relu"]
    # pw1 (channel shuffle already folded into the weight columns) + BN + ReLU
    s = pointwise_dense_bn(x, p["pw1_w"], p["pw1_b"], relu=True)
    # depthwise 3x3 + BN (stride 1 or 2), no ReLU
    s = depthwise_conv3x3_bn(s, p["dw_w"], p["dw_b"],
                             relu=False, stride=p["stride"])
    if p["cat"]:
        # concat fusion: trailing ReLU fused into both epilogues, then concat
        # TODO(synk): write shortcut / s into disjoint channel ranges of one buffer
        shortcut = avgpool3x3_s2_p1(x, relu=final_relu)
        s = pointwise_dense_bn(s, p["pw2_w"], p["pw2_b"], relu=final_relu)
        return jnp.concatenate([shortcut, s], axis=-1)
    # add fusion: residual add + trailing ReLU fused into the pw2 epilogue
    return pointwise_dense_bn(s, p["pw2_w"], p["pw2_b"],
                              relu=final_relu, residual=x)


# --------------------------------------------------------------------------
# Parameter init / prep (deterministic, mirrors the module's weights_init shapes)
# --------------------------------------------------------------------------
def bn_fold(c, eps=1e-5):
    gamma = jnp.ones((c,), jnp.float32)
    beta = jnp.zeros((c,), jnp.float32)
    rm = jnp.zeros((c,), jnp.float32)
    rv = jnp.ones((c,), jnp.float32)
    scale = gamma / jnp.sqrt(rv + eps)
    bias = beta - rm * scale
    return scale, bias


def _block_diag(wg):
    # (g, cin_g, cout_g) -> dense block-diagonal (g*cin_g, g*cout_g)
    g, cin_g, cout_g = wg.shape
    W = jnp.zeros((g * cin_g, g * cout_g), wg.dtype)
    for gi in range(g):
        W = W.at[gi * cin_g:(gi + 1) * cin_g, gi * cout_g:(gi + 1) * cout_g].set(wg[gi])
    return W


def make_unit_params(key, in_ch, out_ch, stride, groups, before_relu):
    mid = out_ch // 4
    cat = (stride != 1) or (in_ch != out_ch)
    exp_out = out_ch - in_ch if cat else out_ch
    k1, k2, k3 = jax.random.split(key, 3)
    pw1_g = jax.random.normal(k1, (groups, in_ch // groups, mid // groups),
                              jnp.float32) * math.sqrt(2.0 / mid)
    dw_w = jax.random.normal(k2, (3, 3, mid), jnp.float32) * math.sqrt(2.0 / (9 * mid))
    pw2_g = jax.random.normal(k3, (groups, mid // groups, exp_out // groups),
                              jnp.float32) * math.sqrt(2.0 / exp_out)
    s1, b1 = bn_fold(mid)
    s2, b2 = bn_fold(mid)
    s3, b3 = bn_fold(exp_out)

    # grouped 1x1 -> dense block-diagonal weights; BN scale folded into columns
    W1 = _block_diag(pw1_g) * s1[None, :]        # (in_ch, mid)
    W2 = _block_diag(pw2_g) * s3[None, :]        # (mid, exp_out)
    w9 = dw_w.reshape(9, mid) * s2[None, :]      # (9, mid) depthwise taps

    # fold channel shuffle into pw1's output columns and its BN bias
    cpg = mid // groups
    o = jnp.arange(mid)
    src = (o % groups) * cpg + (o // groups)     # shuffled channel o <- original src[o]
    W1 = W1[:, src]
    b1 = b1[src]

    return dict(pw1_w=W1.astype(jnp.bfloat16), pw1_b=b1,
                dw_w=w9, dw_b=b2,
                pw2_w=W2.astype(jnp.bfloat16), pw2_b=b3,
                stride=stride, cat=cat, before_relu=before_relu)


def init_shufflenet(key, num_classes=100, groups=3):
    out_channels = {1: [24, 144, 288, 567], 2: [24, 200, 400, 800],
                    3: [24, 240, 480, 960], 4: [24, 272, 544, 1088],
                    8: [24, 384, 768, 1536]}[groups]
    num_blocks = [4, 8, 4]
    keys = jax.random.split(key, 64)
    ki = iter(range(64))

    params = {"num_classes": num_classes}
    w1 = jax.random.normal(keys[next(ki)], (3, 3, 3, out_channels[0]),
                           jnp.float32) * math.sqrt(2.0 / (9 * out_channels[0]))
    s0, b0 = bn_fold(out_channels[0])
    params["conv1_w"] = (w1.reshape(9 * 3, out_channels[0]) * s0[None, :]
                         ).astype(jnp.bfloat16)
    params["conv1_b"] = b0

    in_ch = out_channels[0]
    # NOTE: the torch code's `stage == 2` special case never fires (the `stage`
    # name is shadowed by a list in _make_stage), so every bottleneck pointwise
    # conv is grouped with `groups` groups — reproduced here.
    stage_cfg = [("stage2", num_blocks[0], out_channels[1], False),
                 ("stage3", num_blocks[1], out_channels[2], False),
                 ("stage4", num_blocks[2], out_channels[3], True)]
    for name, nb, oc, before_relu in stage_cfg:
        units = []
        for stride in [2] + [1] * (nb - 1):
            units.append(make_unit_params(keys[next(ki)], in_ch, oc, stride,
                                          groups, before_relu))
            in_ch = oc
        params[name] = units

    # Classifier padded to a lane-dense multiple of 128 output columns so the fc
    # matmul writes unmasked full-lane stores; logits are sliced afterwards.
    ncp = max(128, ((num_classes + 127) // 128) * 128)
    fc_w = jax.random.normal(keys[next(ki)], (out_channels[3], num_classes),
                             jnp.float32) * 0.01
    params["fc_w"] = jnp.zeros((out_channels[3], ncp), jnp.float32
                               ).at[:, :num_classes].set(fc_w).astype(jnp.bfloat16)
    params["fc_b"] = jnp.zeros((ncp,), jnp.float32)
    return params


# --------------------------------------------------------------------------
# Full forward (aux=None path): returns (emb4, logits) like the torch module
# --------------------------------------------------------------------------
def shufflenet_forward(x_nchw, params):
    x = jnp.transpose(x_nchw, (0, 2, 3, 1)).astype(jnp.bfloat16)   # -> NHWC, bf16
    x = conv3x3_dense_bn_relu(x, params["conv1_w"], params["conv1_b"])
    for stage in ("stage2", "stage3", "stage4"):
        for unit in params[stage]:
            x = shuffle_unit_forward(x, unit)

    # before_act=False: emb4 = relu(x), and the classifier branch also uses relu(x)
    xr = jnp.maximum(x, 0).astype(jnp.float32)        # single shared ReLU, f32
    emb4 = xr
    pooled = jnp.mean(xr, axis=(1, 2))                # AdaptiveAvgPool2d((1,1)) + flatten
    logits = matmul_bias_act(pooled, params["fc_w"], params["fc_b"],
                             relu=False, out_dtype=jnp.float32)
    logits = logits[:, :params["num_classes"]]        # drop lane padding
    emb4_nchw = jnp.transpose(emb4, (0, 3, 1, 2))
    return emb4_nchw, logits


# --------------------------------------------------------------------------
if __name__ == "__main__":
    key = jax.random.PRNGKey(0)
    kx, kp = jax.random.split(key)
    x = jax.random.normal(kx, (2, 3, 16, 16), jnp.float32)   # NCHW input
    params = init_shufflenet(kp, num_classes=100, groups=3)

    emb4, logits = shufflenet_forward(x, params)
    emb4 = jax.block_until_ready(emb4)
    logits = jax.block_until_ready(logits)

    assert emb4.shape == (2, 960, 2, 2), emb4.shape
    assert logits.shape == (2, 100), logits.shape
    assert bool(jnp.all(jnp.isfinite(emb4))) and bool(jnp.all(jnp.isfinite(logits)))
    print("KERNEL_OK")
</pallas_src>

<mosaic_0001>
module attributes {stable_mosaic.version = 11 : i64} {
  func.func @_matmul_bias_act_kernel(%arg0: i32, %arg1: memref<256x27xbf16, #tpu.memory_space<vmem>>, %arg2: memref<27x24xbf16, #tpu.memory_space<vmem>>, %arg3: memref<1x24xf32, #tpu.memory_space<vmem>>, %arg4: memref<256x24xbf16, #tpu.memory_space<vmem>>) attributes {dimension_semantics = [#tpu.dimension_semantics<parallel>], iteration_bounds = array<i64: 2>, scalar_prefetch = 0 : i64, scratch_operands = 0 : i64, tpu.core_type = #tpu.core_type<tc>, window_params = [{transform_indices = @transform_0, window_bounds = array<i64: 256, 27>}, {pipeline_mode = #tpu.pipeline_mode<synchronous>, transform_indices = @transform_1, window_bounds = array<i64: 27, 24>}, {pipeline_mode = #tpu.pipeline_mode<synchronous>, transform_indices = @transform_2, window_bounds = array<i64: 1, 24>}, {transform_indices = @transform_3, window_bounds = array<i64: 256, 24>}]} {
    %c0 = arith.constant 0 : index
    %c0_0 = arith.constant 0 : index
    %0 = vector.load %arg1[%c0, %c0_0] : memref<256x27xbf16, #tpu.memory_space<vmem>>, vector<256x27xbf16>
    %c0_1 = arith.constant 0 : index
    %c0_2 = arith.constant 0 : index
    %1 = vector.load %arg2[%c0_1, %c0_2] : memref<27x24xbf16, #tpu.memory_space<vmem>>, vector<27x24xbf16>
    %cst = arith.constant dense<0.000000e+00> : vector<256x24xf32>
    %2 = tpu.matmul %0, %1, %cst {dimension_numbers = #tpu.dot_dimension_numbers<[1], [0], [0], [1], [0, 0, 1, 1], [], []>} : vector<256x27xbf16>, vector<27x24xbf16>, vector<256x24xf32> -> vector<256x24xf32>
    %c0_3 = arith.constant 0 : index
    %c0_4 = arith.constant 0 : index
    %3 = vector.load %arg3[%c0_3, %c0_4] : memref<1x24xf32, #tpu.memory_space<vmem>>, vector<1x24xf32>
    %4 = vector.broadcast %3 : vector<1x24xf32> to vector<256x24xf32>
    %5 = arith.addf %2, %4 : vector<256x24xf32>
    %cst_5 = arith.constant 0.000000e+00 : f32
    %6 = vector.broadcast %cst_5 : f32 to vector<256x24xf32>
    %7 = arith.maximumf %5, %6 : vector<256x24xf32>
    %8 = arith.truncf %7 : vector<256x24xf32> to vector<256x24xbf16>
    %c0_6 = arith.constant 0 : index
    %c0_7 = arith.constant 0 : index
    %9 = vector.load %arg4[%c0_6, %c0_7] : memref<256x24xbf16, #tpu.memory_space<vmem>>, vector<256x24xbf16>
    tpu.vector_store %arg4[%c0_6, %c0_7], %8 {strides = array<i32>} : memref<256x24xbf16, #tpu.memory_space<vmem>>, vector<256x24xbf16>,
    return
  }
  func.func @transform_0(%arg0: i32) -> (i32, i32) {
    %c0_i32 = arith.constant 0 : i32
    %c0_i32_0 = arith.constant 0 : i32
    return %arg0, %c0_i32 : i32, i32
  }
  func.func @transform_1(%arg0: i32) -> (i32, i32) {
    %c0_i32 = arith.constant 0 : i32
    %c0_i32_0 = arith.constant 0 : i32
    %c0_i32_1 = arith.constant 0 : i32
    return %c0_i32, %c0_i32_0 : i32, i32
  }
  func.func @transform_2(%arg0: i32) -> (i32, i32) {
    %c0_i32 = arith.constant 0 : i32
    %c0_i32_0 = arith.constant 0 : i32
    %c0_i32_1 = arith.constant 0 : i32
    return %c0_i32, %c0_i32_0 : i32, i32
  }
  func.func @transform_3(%arg0: i32) -> (i32, i32) {
    %c0_i32 = arith.constant 0 : i32
    %c0_i32_0 = arith.constant 0 : i32
    return %arg0, %c0_i32 : i32, i32
  }
}

</mosaic_0001>

<bundles_post_ra>
// kernel: tpu_custom_call.1
= control target key start
LH: loop header
LB: loop body
LE: loop exit
PB: predicated region body
PF: predicated region fallthrough
CT: control target
= control target key end

     0   :  { %s999_s12 = smov 0   ;;  %s1166_s0 = inlined_call_operand.vmem [shape: bf16[512,27], index: 0, kind: input, shape index: {}]   ;;  %s1167_s1 = inlined_call_operand.vmem [shape: bf16[27,24], index: 1, kind: input, shape index: {}]   ;;  %s1168_s2 = inlined_call_operand.vmem [shape: f32[1,24], index: 2, kind: input, shape index: {}]   ;;  %s1169_s3 = inlined_call_operand.vmem [shape: bf16[512,24], index: 3, kind: output, shape index: {}]  }
   0x1 LB: > { %s775_s13 = sadd.s32 4294967295, %s976_s12   ;;  %p779_p0 = scmp.ge.s32.totalorder %s976_s12, 1  ;;  %s976_s12 = sphi %s999_s12, %s13_s12  }
   0x2   : > { %p138_p1 = scmp.lt.s32.totalorder %s976_s12, 3 }
   0x4   : > { %p139_p2 = pnand %p779_p0, %p138_p1 }
   0x5   : > { %v952_v0 = vld [vmem:[%s1167_s1] sm:$0xff] (!%p139_p2)   ;;  %vm358_vm0 = vcmask (!%p139_p2), 1044480   ;;  %v953_v1 = vld [vmem:[%s1167_s1 + $0x8] sm:$0x3f] (!%p139_p2)   ;;  %vm359_vm1 = vcmask (!%p139_p2), 1045504   ;;  %s780_s18 = sshll.u32 (!%p139_p2), %s775_s13, 5 }
   0x6   : > { %142 = sbr.rel (%p139_p2) target bundleno = 265 (0x109), region = 32  ;;  %903 = vmatprep.subr.bf16.mxu0 (!%p139_p2), %v952_v0  ;;  %939 = vmatprep.subr.bf16.mxu1 (!%p139_p2), %v952_v0  ;;  %v978_v2 = vmov (!%p139_p2), 65535   ;;  %p163_p3 = scmp.lt.s32.totalorder (!%p139_p2), %s780_s18, 63  ;;  %vm309_vm2 = vcmask (!%p139_p2), 220160   ;;  %v1058_v22 = vld [vmem:[%s1168_s2] ss:$0 sm:$0xff] (!%p139_p2) }
   0x7   : > { %904 = vmatpush3.bf16.msra.mxu0 (!%p139_p2), %v952_v0  ;;  %941 = vmatpush3.bf16.msra.mxu1 (!%p139_p2), %v952_v0  ;;  %v360_v3 = vsel (!%p139_p2), %vm358_vm0, 4294967295, %v978_v2  ;;  %vm686_vm3 = vcmask (!%p139_p2), 191488  }
   0x8   : > { %v361_v4 = vsel (!%p139_p2), %vm359_vm1, %v360_v3, 0 }
   0x9   : > { %v363_v5 = vand.u32 (!%p139_p2), %v953_v1, %v361_v4 }
   0xb   : > { %905 = vmatprep.subr.bf16.mxu0 (!%p139_p2), %v363_v5  ;;  %940 = vmatprep.subr.bf16.mxu1 (!%p139_p2), %v363_v5 }
   0xc   : > { %906 = vmatpush3.bf16.msra.mxu0 (!%p139_p2), %v363_v5  ;;  %942 = vmatpush3.bf16.msra.mxu1 (!%p139_p2), %v363_v5 }
   0xd   : > { %s1171_s18 = smov (!%p163_p3, %s780_s18), 63 }
   0xe   : > { %s781_s19 = sshll.u32 %s1171_s18, 2 }
   0xf   : > { %s1021_s22 = scalar_lea.vmem %s1166_s0, %s781_s19  ;;  %s1070_s27 = scalar_lea.vmem %s1169_s3, %s781_s19 }
  0x10   : > { %v954_v6 = vld [vmem:[%s1021_s22] sm:$0xff]   ;;  %v956_v8 = vld [vmem:[%s1021_s22 + $0x8] sm:$0xff]   ;;  %v958_v10 = vld [vmem:[%s1021_s22 + $0x10] sm:$0xff]  }
  0x11   : > { %v955_v7 = vld [vmem:[%s1021_s22 + $0x40] sm:$0xff]   ;;  %907 = vmatprep.mubr.msk.bf16.mxu0 %vm309_vm2, %v954_v6  ;;  %v957_v9 = vld [vmem:[%s1021_s22 + $0x48] sm:$0xff]   ;;  %v959_v11 = vld [vmem:[%s1021_s22 + $0x50] sm:$0xff]  }
  0x12   : > { %923 = vmatprep.mubr.msk.bf16.mxu1 %vm309_vm2, %v955_v7  ;;  %908 = vmatmul.mubr.msk.bf16.vlgmr.msra.gmra.mrb[0].mxu0 %vm309_vm2, %v956_v8  ;;  %v960_v12 = vld [vmem:[%s1021_s22 + $0x18] sm:$0xff]   ;;  %v962_v14 = vld [vmem:[%s1021_s22 + $0x20] sm:$0xff]   ;;  %v964_v16 = vld [vmem:[%s1021_s22 + $0x28] sm:$0xff]  }
  0x13   : > { %924 = vmatmul.mubr.msk.bf16.vlgmr.msra.gmra.mrb[0].mxu1 %vm309_vm2, %v957_v9  ;;  %911 = vmatprep.mubr.msk.bf16.mxu0 %vm309_vm2, %v958_v10  ;;  %v961_v13 = vld [vmem:[%s1021_s22 + $0x58] sm:$0xff]   ;;  %v963_v15 = vld [vmem:[%s1021_s22 + $0x60] sm:$0xff]   ;;  %v965_v17 = vld [vmem:[%s1021_s22 + $0x68] sm:$0xff]  }
  0x14   : > { %927 = vmatprep.mubr.msk.bf16.mxu1 %vm309_vm2, %v959_v11  ;;  %v966_v18 = vld [vmem:[%s1021_s22 + $0x30] sm:$0xff]   ;;  %v968_v20 = vld [vmem:[%s1021_s22 + $0x38] sm:$0xff]  }
  0x15   : > { %v967_v19 = vld [vmem:[%s1021_s22 + $0x70] sm:$0xff]   ;;  %v969_v21 = vld [vmem:[%s1021_s22 + $0x78] sm:$0xff]  }
  0x1a   : > { %912 = vmatmul.mubr.msk.bf16.gmra.mrb[4].mxu0 %vm309_vm2, %v960_v12 }
  0x1b   : > { %928 = vmatmul.mubr.msk.bf16.gmra.mrb[4].mxu1 %vm309_vm2, %v961_v13  ;;  %915 = vmatprep.mubr.msk.bf16.mxu0 %vm309_vm2, %v962_v14 }
  0x1c   : > { %931 = vmatprep.mubr.msk.bf16.mxu1 %vm309_vm2, %v963_v15 }
  0x22   : > { %916 = vmatmul.mubr.msk.bf16.gmra.mrb[8].mxu0 %vm309_vm2, %v964_v16 }
  0x23   : > { %932 = vmatmul.mubr.msk.bf16.gmra.mrb[8].mxu1 %vm309_vm2, %v965_v17  ;;  %919 = vmatprep.mubr.msk.bf16.mxu0 %vm309_vm2, %v966_v18 }
  0x24   : > { %935 = vmatprep.mubr.msk.bf16.mxu1 %vm309_vm2, %v967_v19 }
  0x2a   : > { %920 = vmatmul.mubr.msk.bf16.gmra.mrb[12].mxu0 %vm309_vm2, %v968_v20 }
  0x2b   : > { %936 = vmatmul.mubr.msk.bf16.gmra.mrb[12].mxu1 %vm309_vm2, %v969_v21 }
  0xe5   : > { %v909_v23 = vpop.f32.mrb[0].mxu0 }
  0xe6   : > { %v408_v24 = vadd.f32 %v909_v23, %v1058_v22  ;;  %v925_v25 = vpop.f32.mrb[0].mxu1  ;;  %v399_v26 = vpop.f32.mrb[1].mxu0 }
  0xe7   : > { %v472_v27 = vadd.f32 %v925_v25, %v1058_v22  ;;  %v400_v28 = vadd.f32 %v1058_v22, %v399_v26  ;;  %v463_v29 = vpop.f32.mrb[1].mxu1  ;;  %v910_v30 = vpop.f32.mrb[2].mxu0 }
  0xe8   : > { %v528_v31 = vmax.f32 %v408_v24, 0.0  ;;  %v464_v32 = vadd.f32 %v1058_v22, %v463_v29  ;;  %v411_v33 = vadd.f32 %v910_v30, %v1058_v22  ;;  %v926_v34 = vpop.f32.mrb[2].mxu1  ;;  %v402_v35 = vpop.f32.mrb[3].mxu0 }
  0xe9   : > { %v544_v36 = vmax.f32 %v472_v27, 0.0  ;;  %v526_v37 = vmax.f32 %v400_v28, 0.0  ;;  %v475_v38 = vadd.f32 %v926_v34, %v1058_v22  ;;  %v403_v39 = vadd.f32 %v1058_v22, %v402_v35  ;;  %v466_v40 = vpop.f32.mrb[3].mxu1 }
  0xea   : > { %v855_v41 = vpack.c.bf16 %v528_v31, %v528_v31  ;;  %v542_v42 = vmax.f32 %v464_v32, 0.0  ;;  %v529_v43 = vmax.f32 %v411_v33, 0.0  ;;  %v467_v44 = vadd.f32 %v1058_v22, %v466_v40 }
  0xeb   : > { %v871_v45 = vpack.c.bf16 %v544_v36, %v544_v36  ;;  %v853_v46 = vpack.c.bf16 %v526_v37, %v526_v37  ;;  %v545_v47 = vmax.f32 %v475_v38, 0.0  ;;  %v527_v48 = vmax.f32 %v403_v39, 0.0 }
  0xec   : > { %689 = vst.msk [vmem:[%s1070_s27 + $0x8] sm:$0xf] %vm686_vm3, %v855_v41  ;;  %v869_v49 = vpack.c.bf16 %v542_v42, %v542_v42  ;;  %v856_v50 = vpack.c.bf16 %v529_v43, %v529_v43  ;;  %v543_v51 = vmax.f32 %v467_v44, 0.0 }
  0xed   : > { %705 = vst.msk [vmem:[%s1070_s27 + $0x48] sm:$0xf] %vm686_vm3, %v871_v45  ;;  %687 = vst.msk [vmem:[%s1070_s27] sm:$0xf] %vm686_vm3, %v853_v46  ;;  %v872_v52 = vpack.c.bf16 %v545_v47, %v545_v47  ;;  %v854_v53 = vpack.c.bf16 %v527_v48, %v527_v48  ;;  %v913_v54 = vpop.f32.mrb[4].mxu0 }
  0xee   : > { %703 = vst.msk [vmem:[%s1070_s27 + $0x40] sm:$0xf] %vm686_vm3, %v869_v49  ;;  %690 = vst.msk [vmem:[%s1070_s27 + $0xc] sm:$0xf] %vm686_vm3, %v856_v50  ;;  %v870_v55 = vpack.c.bf16 %v543_v51, %v543_v51  ;;  %v424_v56 = vadd.f32 %v913_v54, %v1058_v22  ;;  %v929_v57 = vpop.f32.mrb[4].mxu1  ;;  %v415_v58 = vpop.f32.mrb[5].mxu0 }
  0xef   : > { %706 = vst.msk [vmem:[%s1070_s27 + $0x4c] sm:$0xf] %vm686_vm3, %v872_v52  ;;  %688 = vst.msk [vmem:[%s1070_s27 + $0x4] sm:$0xf] %vm686_vm3, %v854_v53  ;;  %v488_v59 = vadd.f32 %v929_v57, %v1058_v22  ;;  %v416_v60 = vadd.f32 %v1058_v22, %v415_v58  ;;  %v479_v61 = vpop.f32.mrb[5].mxu1  ;;  %v914_v62 = vpop.f32.mrb[6].mxu0 }
  0xf0   : > { %704 = vst.msk [vmem:[%s1070_s27 + $0x44] sm:$0xf] %vm686_vm3, %v870_v55  ;;  %v532_v63 = vmax.f32 %v424_v56, 0.0  ;;  %v480_v0 = vadd.f32 %v1058_v22, %v479_v61  ;;  %v427_v1 = vadd.f32 %v914_v62, %v1058_v22  ;;  %v930_v2 = vpop.f32.mrb[6].mxu1  ;;  %v418_v3 = vpop.f32.mrb[7].mxu0 }
  0xf1   : > { %v548_v4 = vmax.f32 %v488_v59, 0.0  ;;  %v530_v5 = vmax.f32 %v416_v60, 0.0  ;;  %v491_v6 = vadd.f32 %v930_v2, %v1058_v22  ;;  %v419_v7 = vadd.f32 %v1058_v22, %v418_v3  ;;  %v482_v8 = vpop.f32.mrb[7].mxu1 }
  0xf2   : > { %v859_v9 = vpack.c.bf16 %v532_v63, %v532_v63  ;;  %v546_v10 = vmax.f32 %v480_v0, 0.0  ;;  %v533_v11 = vmax.f32 %v427_v1, 0.0  ;;  %v483_v12 = vadd.f32 %v1058_v22, %v482_v8 }
  0xf3   : > { %v875_v13 = vpack.c.bf16 %v548_v4, %v548_v4  ;;  %v857_v14 = vpack.c.bf16 %v530_v5, %v530_v5  ;;  %v549_v15 = vmax.f32 %v491_v6, 0.0  ;;  %v531_v16 = vmax.f32 %v419_v7, 0.0 }
  0xf4   : > { %693 = vst.msk [vmem:[%s1070_s27 + $0x18] sm:$0xf] %vm686_vm3, %v859_v9  ;;  %v873_v17 = vpack.c.bf16 %v546_v10, %v546_v10  ;;  %v860_v18 = vpack.c.bf16 %v533_v11, %v533_v11  ;;  %v547_v19 = vmax.f32 %v483_v12, 0.0 }
  0xf5   : > { %709 = vst.msk [vmem:[%s1070_s27 + $0x58] sm:$0xf] %vm686_vm3, %v875_v13  ;;  %691 = vst.msk [vmem:[%s1070_s27 + $0x10] sm:$0xf] %vm686_vm3, %v857_v14  ;;  %v876_v20 = vpack.c.bf16 %v549_v15, %v549_v15  ;;  %v858_v21 = vpack.c.bf16 %v531_v16, %v531_v16  ;;  %v917_v23 = vpop.f32.mrb[8].mxu0 }
  0xf6   : > { %707 = vst.msk [vmem:[%s1070_s27 + $0x50] sm:$0xf] %vm686_vm3, %v873_v17  ;;  %694 = vst.msk [vmem:[%s1070_s27 + $0x1c] sm:$0xf] %vm686_vm3, %v860_v18  ;;  %v874_v24 = vpack.c.bf16 %v547_v19, %v547_v19  ;;  %v440_v25 = vadd.f32 %v917_v23, %v1058_v22  ;;  %v933_v26 = vpop.f32.mrb[8].mxu1  ;;  %v431_v27 = vpop.f32.mrb[9].mxu0 }
  0xf7   : > { %710 = vst.msk [vmem:[%s1070_s27 + $0x5c] sm:$0xf] %vm686_vm3, %v876_v20  ;;  %692 = vst.msk [vmem:[%s1070_s27 + $0x14] sm:$0xf] %vm686_vm3, %v858_v21  ;;  %v504_v28 = vadd.f32 %v933_v26, %v1058_v22  ;;  %v432_v29 = vadd.f32 %v1058_v22, %v431_v27  ;;  %v495_v30 = vpop.f32.mrb[9].mxu1  ;;  %v918_v31 = vpop.f32.mrb[10].mxu0 }
  0xf8   : > { %708 = vst.msk [vmem:[%s1070_s27 + $0x54] sm:$0xf] %vm686_vm3, %v874_v24  ;;  %v536_v32 = vmax.f32 %v440_v25, 0.0  ;;  %v496_v33 = vadd.f32 %v1058_v22, %v495_v30  ;;  %v443_v34 = vadd.f32 %v918_v31, %v1058_v22  ;;  %v934_v35 = vpop.f32.mrb[10].mxu1  ;;  %v434_v36 = vpop.f32.mrb[11].mxu0 }
  0xf9   : > { %v552_v37 = vmax.f32 %v504_v28, 0.0  ;;  %v534_v38 = vmax.f32 %v432_v29, 0.0  ;;  %v507_v39 = vadd.f32 %v934_v35, %v1058_v22  ;;  %v435_v40 = vadd.f32 %v1058_v22, %v434_v36  ;;  %v498_v41 = vpop.f32.mrb[11].mxu1 }
  0xfa   : > { %v863_v42 = vpack.c.bf16 %v536_v32, %v536_v32  ;;  %v550_v43 = vmax.f32 %v496_v33, 0.0  ;;  %v537_v44 = vmax.f32 %v443_v34, 0.0  ;;  %v499_v45 = vadd.f32 %v1058_v22, %v498_v41 }
  0xfb   : > { %v879_v46 = vpack.c.bf16 %v552_v37, %v552_v37  ;;  %v861_v47 = vpack.c.bf16 %v534_v38, %v534_v38  ;;  %v553_v48 = vmax.f32 %v507_v39, 0.0  ;;  %v535_v49 = vmax.f32 %v435_v40, 0.0 }
  0xfc   : > { %697 = vst.msk [vmem:[%s1070_s27 + $0x28] sm:$0xf] %vm686_vm3, %v863_v42  ;;  %v877_v50 = vpack.c.bf16 %v550_v43, %v550_v43  ;;  %v864_v51 = vpack.c.bf16 %v537_v44, %v537_v44  ;;  %v551_v52 = vmax.f32 %v499_v45, 0.0 }
  0xfd   : > { %713 = vst.msk [vmem:[%s1070_s27 + $0x68] sm:$0xf] %vm686_vm3, %v879_v46  ;;  %695 = vst.msk [vmem:[%s1070_s27 + $0x20] sm:$0xf] %vm686_vm3, %v861_v47  ;;  %v880_v53 = vpack.c.bf16 %v553_v48, %v553_v48  ;;  %v862_v54 = vpack.c.bf16 %v535_v49, %v535_v49  ;;  %v921_v55 = vpop.f32.mrb[12].mxu0 }
  0xfe   : > { %711 = vst.msk [vmem:[%s1070_s27 + $0x60] sm:$0xf] %vm686_vm3, %v877_v50  ;;  %698 = vst.msk [vmem:[%s1070_s27 + $0x2c] sm:$0xf] %vm686_vm3, %v864_v51  ;;  %v878_v56 = vpack.c.bf16 %v551_v52, %v551_v52  ;;  %v456_v57 = vadd.f32 %v921_v55, %v1058_v22  ;;  %v937_v58 = vpop.f32.mrb[12].mxu1  ;;  %v447_v59 = vpop.f32.mrb[13].mxu0 }
  0xff   : > { %714 = vst.msk [vmem:[%s1070_s27 + $0x6c] sm:$0xf] %vm686_vm3, %v880_v53  ;;  %696 = vst.msk [vmem:[%s1070_s27 + $0x24] sm:$0xf] %vm686_vm3, %v862_v54  ;;  %v520_v60 = vadd.f32 %v937_v58, %v1058_v22  ;;  %v448_v61 = vadd.f32 %v1058_v22, %v447_v59  ;;  %v511_v62 = vpop.f32.mrb[13].mxu1  ;;  %v922_v63 = vpop.f32.mrb[14].mxu0 }
 0x100   : > { %712 = vst.msk [vmem:[%s1070_s27 + $0x64] sm:$0xf] %vm686_vm3, %v878_v56  ;;  %v540_v0 = vmax.f32 %v456_v57, 0.0  ;;  %v512_v1 = vadd.f32 %v1058_v22, %v511_v62  ;;  %v459_v2 = vadd.f32 %v922_v63, %v1058_v22  ;;  %v938_v3 = vpop.f32.mrb[14].mxu1  ;;  %v450_v4 = vpop.f32.mrb[15].mxu0 }
 0x101   : > { %v556_v5 = vmax.f32 %v520_v60, 0.0  ;;  %v538_v6 = vmax.f32 %v448_v61, 0.0  ;;  %v523_v7 = vadd.f32 %v938_v3, %v1058_v22  ;;  %v451_v8 = vadd.f32 %v1058_v22, %v450_v4  ;;  %v514_v9 = vpop.f32.mrb[15].mxu1 }
 0x102   : > { %v867_v10 = vpack.c.bf16 %v540_v0, %v540_v0  ;;  %v554_v11 = vmax.f32 %v512_v1, 0.0  ;;  %v541_v12 = vmax.f32 %v459_v2, 0.0  ;;  %v515_v13 = vadd.f32 %v1058_v22, %v514_v9 }
 0x103   : > { %v883_v14 = vpack.c.bf16 %v556_v5, %v556_v5  ;;  %v865_v15 = vpack.c.bf16 %v538_v6, %v538_v6  ;;  %v557_v16 = vmax.f32 %v523_v7, 0.0  ;;  %v539_v17 = vmax.f32 %v451_v8, 0.0 }
 0x104   : > { %701 = vst.msk [vmem:[%s1070_s27 + $0x38] sm:$0xf] %vm686_vm3, %v867_v10  ;;  %v881_v18 = vpack.c.bf16 %v554_v11, %v554_v11  ;;  %v868_v19 = vpack.c.bf16 %v541_v12, %v541_v12  ;;  %v555_v20 = vmax.f32 %v515_v13, 0.0 }
 0x105   : > { %717 = vst.msk [vmem:[%s1070_s27 + $0x78] sm:$0xf] %vm686_vm3, %v883_v14  ;;  %699 = vst.msk [vmem:[%s1070_s27 + $0x30] sm:$0xf] %vm686_vm3, %v865_v15  ;;  %v884_v21 = vpack.c.bf16 %v557_v16, %v557_v16  ;;  %v866_v23 = vpack.c.bf16 %v539_v17, %v539_v17 }
 0x106   : > { %715 = vst.msk [vmem:[%s1070_s27 + $0x70] sm:$0xf] %vm686_vm3, %v881_v18  ;;  %702 = vst.msk [vmem:[%s1070_s27 + $0x3c] sm:$0xf] %vm686_vm3, %v868_v19  ;;  %v882_v22 = vpack.c.bf16 %v555_v20, %v555_v20 }
 0x107   : > { %718 = vst.msk [vmem:[%s1070_s27 + $0x7c] sm:$0xf] %vm686_vm3, %v884_v21  ;;  %700 = vst.msk [vmem:[%s1070_s27 + $0x34] sm:$0xf] %vm686_vm3, %v866_v23 }
 0x108   : > { %716 = vst.msk [vmem:[%s1070_s27 + $0x74] sm:$0xf] %vm686_vm3, %v882_v22 }
 0x109 PF: > { %s13_s12 = sadd.s32 1, %s976_s12  }
 0x10a   : > { %p10_p4 = scmp.ge.s32.totalorder %s13_s12, 4  }
 0x10c   :  { %12 = sbr.rel (!%p10_p4) target bundleno = 1 (0x1), region = 62 }

</bundles_post_ra>
